<compile_context>
chip_gen: v7x
topology: tpu7x:2x2x1
jax: 0.10.0
libtpu: 0.0.40
codegen_flags: <defaults>
</compile_context>

<pallas_src>
import jax
import jax.numpy as jnp
from jax.experimental import pallas as pl
from jax.experimental.pallas import tpu as pltpu


def _round_up(x, m):
    return (x + m - 1) // m * m


def fused_linear_kernel(x_ref, w_ref, b_ref, y_ref):
    # One MXU matmul of the batch tile against the VMEM-resident fused weight,
    # f32 accumulation, f32 bias add (sublane broadcast), store in out dtype.
    acc = jnp.dot(x_ref[...], w_ref[...], preferred_element_type=jnp.float32)
    y_ref[...] = (acc + b_ref[...]).astype(y_ref.dtype)


def make_fused_params(w1, b1, w2, b2, *, compute_dtype=jnp.bfloat16):
    """Fold the two Linears into one: W = w1 @ w2, b = b1 @ w2 + b2.

    Call ONCE per parameter set (outside the per-step forward path) and feed
    the results to output_net_1_fused, so the fusion matmul / padding / casts
    are not re-executed as tiny XLA kernels on every forward call.

    w1: [D, 2H] (transposed torch weight), b1: [2H], w2: [2H, C], b2: [C]
    Returns (W [D, C] in compute_dtype-or-f32, b [1, C] in f32).
    """
    b1 = jnp.reshape(b1, (1, -1)).astype(jnp.float32)
    b2 = jnp.reshape(b2, (1, -1)).astype(jnp.float32)
    w = jnp.dot(w1.astype(jnp.float32), w2.astype(jnp.float32),
                preferred_element_type=jnp.float32)                    # [D, C]
    b = jnp.dot(b1, w2.astype(jnp.float32),
                preferred_element_type=jnp.float32) + b2               # [1, C]
    if compute_dtype is not None:
        w = w.astype(compute_dtype)
    return w, b  # bias stays f32: it is added onto the f32 accumulator


def output_net_1_fused(x, w, b, *, batch_tile=512, min_pallas_batch=256):
    """Forward with pre-fused params: y = x @ W + b, y in x.dtype.

    x: [B, D], w: [D, C] (bf16 or f32), b: [1, C] or [C] (f32).
    """
    B, D = x.shape
    Dw, C = w.shape
    assert Dw == D, (Dw, D)
    out_dtype = x.dtype

    # MXU operands in the weight dtype (bf16 by default); accumulation is f32.
    x_c = x if x.dtype == w.dtype else x.astype(w.dtype)
    b = b.astype(jnp.float32).reshape(1, C)

    # Tiny-batch regime: overhead-bound -> one fused XLA dot, no pallas_call.
    if B < min_pallas_batch:
        acc = jnp.dot(x_c, w, preferred_element_type=jnp.float32) + b
        return acc.astype(out_dtype)

    # Batch tile: multiple of 16 (bf16 sublane packing, also satisfies the
    # sublane-8 block constraint) and capped so the grid has >= 2 steps, so
    # both v7x TensorCores get work (harmless on single-TC v5e/v6e).
    TB = min(batch_tile, _round_up(pl.cdiv(B, 2), 16))
    grid = (pl.cdiv(B, TB),)  # ragged last block handled by Pallas -> no x pad

    def _nbytes(a):
        return a.size * a.dtype.itemsize

    cost = pl.CostEstimate(
        flops=2 * B * D * C,
        transcendentals=0,
        bytes_accessed=(_nbytes(x_c) + _nbytes(w) + _nbytes(b)
                        + B * C * jnp.dtype(out_dtype).itemsize),
    )

    # VMEM footprint here is tiny; a scaled-up variant should budget
    # W_bytes + 2*(x_tile + out_tile) against the 32 MiB scoped default on
    # v7x and raise vmem_limit_bytes if needed.
    y = pl.pallas_call(
        fused_linear_kernel,
        out_shape=jax.ShapeDtypeStruct((B, C), out_dtype),
        grid_spec=pl.GridSpec(
            grid=grid,
            in_specs=[
                # Pipelined batch tile of x.
                pl.BlockSpec((TB, D), lambda i: (i, 0)),
                # Resident fused weight: block index never changes -> single
                # buffer, no pointless double-buffering of a constant.
                pl.BlockSpec((D, C), lambda i: (0, 0),
                             pipeline_mode=pl.Buffered(1)),
                # Resident f32 bias row.
                pl.BlockSpec((1, C), lambda i: (0, 0),
                             pipeline_mode=pl.Buffered(1)),
            ],
            # Last dim == full C (legal) -> only real columns written to HBM.
            out_specs=pl.BlockSpec((TB, C), lambda i: (i, 0)),
        ),
        compiler_params=pltpu.CompilerParams(
            dimension_semantics=("parallel",),
        ),
        cost_estimate=cost,
    )(x_c, w, b)
    return y


def output_net_1(x, w1, b1, w2, b2, *, compute_dtype=jnp.bfloat16,
                 batch_tile=512, min_pallas_batch=256):
    """Convenience wrapper matching the torch module's forward signature.

    NOTE: this re-runs the weight fusion each call; for repeated calls hoist
    make_fused_params() and call output_net_1_fused() directly.
    """
    w, b = make_fused_params(w1, b1, w2, b2, compute_dtype=compute_dtype)
    return output_net_1_fused(x, w, b, batch_tile=batch_tile,
                              min_pallas_batch=min_pallas_batch)


def _reference(x, w1, b1, w2, b2):
    h = x @ w1 + jnp.reshape(b1, (1, -1))
    return h @ w2 + jnp.reshape(b2, (1, -1))


if __name__ == "__main__":
    # Module hyperparameters (input_size, args.hidden_layer, args.out_class_1)
    B = 256            # batch (large enough to exercise the tiled Pallas path)
    input_size = 32
    hidden_layer = 16
    out_class_1 = 4
    H2 = hidden_layer * 2

    key = jax.random.PRNGKey(0)
    kx, kw1, kb1, kw2, kb2 = jax.random.split(key, 5)

    x = jax.random.normal(kx, (B, input_size), dtype=jnp.float32)

    # Deterministic init mimicking torch.nn.Linear default (uniform +/- 1/sqrt(fan_in))
    lim1 = 1.0 / jnp.sqrt(jnp.float32(input_size))
    w1 = jax.random.uniform(kw1, (input_size, H2), jnp.float32, -lim1, lim1)
    b1 = jax.random.uniform(kb1, (H2,), jnp.float32, -lim1, lim1)

    lim2 = 1.0 / jnp.sqrt(jnp.float32(H2))
    w2 = jax.random.uniform(kw2, (H2, out_class_1), jnp.float32, -lim2, lim2)
    b2 = jax.random.uniform(kb2, (out_class_1,), jnp.float32, -lim2, lim2)

    y_ref = _reference(x, w1, b1, w2, b2)

    # --- f32 operand path, batch_tile=128 -> grid=(2,), tight tolerance. ---
    w_f32, b_f32 = make_fused_params(w1, b1, w2, b2, compute_dtype=None)
    y32 = output_net_1_fused(x, w_f32, b_f32, batch_tile=128,
                             min_pallas_batch=64)
    y32 = jax.block_until_ready(y32)
    assert y32.shape == (B, out_class_1)
    assert jnp.allclose(y32, y_ref, atol=1e-5, rtol=1e-5), "f32 mismatch"

    # --- default bf16 operand path + ragged batch (B not multiple of TB). ---
    w_bf, b_bf = make_fused_params(w1, b1, w2, b2)        # bf16 fused weight
    Br = 200                                              # ragged last block
    ybf = output_net_1_fused(x[:Br], w_bf, b_bf, batch_tile=128,
                             min_pallas_batch=64)
    ybf = jax.block_until_ready(ybf)
    assert ybf.shape == (Br, out_class_1)
    # bf16 operands (f32 accumulation) -> loosened tolerance vs f32 reference.
    assert jnp.allclose(ybf, y_ref[:Br], atol=2e-2, rtol=2e-2), "bf16 mismatch"

    print("KERNEL_OK")
</pallas_src>

<mosaic_0001>
module attributes {stable_mosaic.version = 11 : i64} {
  func.func @fused_linear_kernel(%arg0: i32, %arg1: memref<128x32xf32, #tpu.memory_space<vmem>>, %arg2: memref<32x4xf32, #tpu.memory_space<vmem>>, %arg3: memref<1x4xf32, #tpu.memory_space<vmem>>, %arg4: memref<128x4xf32, #tpu.memory_space<vmem>>) attributes {dimension_semantics = [#tpu.dimension_semantics<parallel>], iteration_bounds = array<i64: 2>, scalar_prefetch = 0 : i64, scratch_operands = 0 : i64, tpu.core_type = #tpu.core_type<tc>, window_params = [{transform_indices = @transform_0, window_bounds = array<i64: 128, 32>}, {pipeline_mode = #tpu.pipeline_mode<synchronous>, transform_indices = @transform_1, window_bounds = array<i64: 32, 4>}, {pipeline_mode = #tpu.pipeline_mode<synchronous>, transform_indices = @transform_2, window_bounds = array<i64: 1, 4>}, {transform_indices = @transform_3, window_bounds = array<i64: 128, 4>}]} {
    %c0 = arith.constant 0 : index
    %c0_0 = arith.constant 0 : index
    %0 = vector.load %arg1[%c0, %c0_0] : memref<128x32xf32, #tpu.memory_space<vmem>>, vector<128x32xf32>
    %c0_1 = arith.constant 0 : index
    %c0_2 = arith.constant 0 : index
    %1 = vector.load %arg2[%c0_1, %c0_2] : memref<32x4xf32, #tpu.memory_space<vmem>>, vector<32x4xf32>
    %cst = arith.constant dense<0.000000e+00> : vector<128x4xf32>
    %2 = tpu.matmul %0, %1, %cst {dimension_numbers = #tpu.dot_dimension_numbers<[1], [0], [0], [1], [0, 0, 1, 1], [], []>} : vector<128x32xf32>, vector<32x4xf32>, vector<128x4xf32> -> vector<128x4xf32>
    %c0_3 = arith.constant 0 : index
    %c0_4 = arith.constant 0 : index
    %3 = vector.load %arg3[%c0_3, %c0_4] : memref<1x4xf32, #tpu.memory_space<vmem>>, vector<1x4xf32>
    %4 = vector.broadcast %3 : vector<1x4xf32> to vector<128x4xf32>
    %5 = arith.addf %2, %4 : vector<128x4xf32>
    %c0_5 = arith.constant 0 : index
    %c0_6 = arith.constant 0 : index
    %6 = vector.load %arg4[%c0_5, %c0_6] : memref<128x4xf32, #tpu.memory_space<vmem>>, vector<128x4xf32>
    tpu.vector_store %arg4[%c0_5, %c0_6], %5 {strides = array<i32>} : memref<128x4xf32, #tpu.memory_space<vmem>>, vector<128x4xf32>,
    return
  }
  func.func @transform_0(%arg0: i32) -> (i32, i32) {
    %c0_i32 = arith.constant 0 : i32
    %c0_i32_0 = arith.constant 0 : i32
    return %arg0, %c0_i32 : i32, i32
  }
  func.func @transform_1(%arg0: i32) -> (i32, i32) {
    %c0_i32 = arith.constant 0 : i32
    %c0_i32_0 = arith.constant 0 : i32
    %c0_i32_1 = arith.constant 0 : i32
    return %c0_i32, %c0_i32_0 : i32, i32
  }
  func.func @transform_2(%arg0: i32) -> (i32, i32) {
    %c0_i32 = arith.constant 0 : i32
    %c0_i32_0 = arith.constant 0 : i32
    %c0_i32_1 = arith.constant 0 : i32
    return %c0_i32, %c0_i32_0 : i32, i32
  }
  func.func @transform_3(%arg0: i32) -> (i32, i32) {
    %c0_i32 = arith.constant 0 : i32
    %c0_i32_0 = arith.constant 0 : i32
    return %arg0, %c0_i32 : i32, i32
  }
}

</mosaic_0001>

<bundles_post_ra>
// kernel: tpu_custom_call.1
= control target key start
LH: loop header
LB: loop body
LE: loop exit
PB: predicated region body
PF: predicated region fallthrough
CT: control target
= control target key end

     0   :  { %s596_s12 = smov 0   ;;  %s703_s0 = inlined_call_operand.vmem [shape: f32[256,32], index: 0, kind: input, shape index: {}]   ;;  %s704_s1 = inlined_call_operand.vmem [shape: f32[32,4], index: 1, kind: input, shape index: {}]   ;;  %s705_s2 = inlined_call_operand.vmem [shape: f32[1,4], index: 2, kind: input, shape index: {}]   ;;  %s706_s3 = inlined_call_operand.vmem [shape: f32[256,4], index: 3, kind: output, shape index: {}]  }
   0x1 LB: > { %s468_s13 = sadd.s32 4294967295, %s574_s12   ;;  %p472_p0 = scmp.ge.s32.totalorder %s574_s12, 1  ;;  %s574_s12 = sphi %s596_s12, %s13_s12  }
   0x2   : > { %p138_p1 = scmp.lt.s32.totalorder %s574_s12, 3 }
   0x4   : > { %p139_p2 = pnand %p472_p0, %p138_p1 }
   0x5   : > { %v190_v0 = vld [vmem:[%s704_s1] sm:$0xff] (!%p139_p2)  ;;  %v191_v1 = vld [vmem:[%s704_s1 + $0x8] sm:$0xff] (!%p139_p2)  ;;  %v192_v2 = vld [vmem:[%s704_s1 + $0x10] sm:$0xff] (!%p139_p2)  ;;  %s473_s20 = sshll.u32 (!%p139_p2), %s468_s13, 4  ;;  %vm201_vm0 = vcmask (!%p139_p2), 261120   ;;  %vm395_vm1 = vcmask (!%p139_p2), 31744  }
   0x6   : > { %142 = sbr.rel (%p139_p2) target bundleno = 247 (0xf7), region = 32  ;;  %v548_v3 = vpack.c.bf16 (!%p139_p2), %v191_v1, %v190_v0  ;;  %v193_v4 = vld [vmem:[%s704_s1 + $0x18] sm:$0xff] (!%p139_p2)  ;;  %p163_p3 = scmp.lt.s32.totalorder (!%p139_p2), %s473_s20, 31  ;;  %v477_v22 = vld [vmem:[%s705_s2] ss:$0 sm:$0xff] (!%p139_p2) }
   0x7   : > { %v552_v5 = vpack.c.bf16 (!%p139_p2), %v193_v4, %v192_v2 }
   0x8   : > { %549 = vmatprep.subr.bf16.mxu0 (!%p139_p2), %v548_v3  ;;  %556 = vmatprep.subr.bf16.mxu1 (!%p139_p2), %v548_v3 }
   0x9   : > { %551 = vmatpush3.bf16.msra.mxu0 (!%p139_p2), %v548_v3  ;;  %558 = vmatpush3.bf16.msra.mxu1 (!%p139_p2), %v548_v3 }
   0xa   : > { %553 = vmatprep.subr.bf16.mxu0 (!%p139_p2), %v552_v5  ;;  %557 = vmatprep.subr.bf16.mxu1 (!%p139_p2), %v552_v5 }
   0xd   : > { %s708_s20 = smov (!%p163_p3, %s473_s20), 31  ;;  %555 = vmatpush3.bf16.msra.mxu0 %v552_v5  ;;  %559 = vmatpush3.bf16.msra.mxu1 %v552_v5 }
   0xe   : > { %s474_s23 = sshll.u32 %s708_s20, 3 }
   0xf   : > { %s624_s26 = scalar_lea.vmem %s703_s0, %s474_s23  ;;  %s666_s4 = scalar_lea.vmem %s706_s3, %s474_s23 }
  0x10   : > { %v174_v6 = vld [vmem:[%s624_s26] sm:$0xff]  ;;  %v175_v8 = vld [vmem:[%s624_s26 + $0x8] sm:$0xff]  ;;  %v176_v10 = vld [vmem:[%s624_s26 + $0x10] sm:$0xff] }
  0x11   : > { %v182_v7 = vld [vmem:[%s624_s26 + $0x40] sm:$0xff]  ;;  %v183_v9 = vld [vmem:[%s624_s26 + $0x48] sm:$0xff]  ;;  %524 = vmatprep.mubr.msk.f32.mxu0 %vm201_vm0, %v174_v6  ;;  %v184_v11 = vld [vmem:[%s624_s26 + $0x50] sm:$0xff] }
  0x12   : > { %536 = vmatprep.mubr.msk.f32.mxu1 %vm201_vm0, %v182_v7  ;;  %525 = vmatmul.mubr.msk.f32.vlgmr.msra.gmra.mrb[0].mxu0 %vm201_vm0, %v175_v8  ;;  %v177_v12 = vld [vmem:[%s624_s26 + $0x18] sm:$0xff]  ;;  %v178_v14 = vld [vmem:[%s624_s26 + $0x20] sm:$0xff]  ;;  %v179_v16 = vld [vmem:[%s624_s26 + $0x28] sm:$0xff] }
  0x13   : > { %537 = vmatmul.mubr.msk.f32.vlgmr.msra.gmra.mrb[0].mxu1 %vm201_vm0, %v183_v9  ;;  %527 = vmatprep.mubr.msk.f32.mxu0 %vm201_vm0, %v176_v10  ;;  %v185_v13 = vld [vmem:[%s624_s26 + $0x58] sm:$0xff]  ;;  %v186_v15 = vld [vmem:[%s624_s26 + $0x60] sm:$0xff]  ;;  %v187_v17 = vld [vmem:[%s624_s26 + $0x68] sm:$0xff] }
  0x14   : > { %539 = vmatprep.mubr.msk.f32.mxu1 %vm201_vm0, %v184_v11  ;;  %v180_v18 = vld [vmem:[%s624_s26 + $0x30] sm:$0xff]  ;;  %v181_v20 = vld [vmem:[%s624_s26 + $0x38] sm:$0xff] }
  0x15   : > { %v188_v19 = vld [vmem:[%s624_s26 + $0x70] sm:$0xff]  ;;  %v189_v21 = vld [vmem:[%s624_s26 + $0x78] sm:$0xff] }
  0x16   : > { %528 = vmatmul.mubr.msk.f32.gmra.mrb[2].mxu0 %vm201_vm0, %v177_v12 }
  0x17   : > { %540 = vmatmul.mubr.msk.f32.gmra.mrb[2].mxu1 %vm201_vm0, %v185_v13  ;;  %530 = vmatprep.mubr.msk.f32.mxu0 %vm201_vm0, %v178_v14 }
  0x18   : > { %542 = vmatprep.mubr.msk.f32.mxu1 %vm201_vm0, %v186_v15 }
  0x1a   : > { %531 = vmatmul.mubr.msk.f32.gmra.mrb[4].mxu0 %vm201_vm0, %v179_v16 }
  0x1b   : > { %543 = vmatmul.mubr.msk.f32.gmra.mrb[4].mxu1 %vm201_vm0, %v187_v17  ;;  %533 = vmatprep.mubr.msk.f32.mxu0 %vm201_vm0, %v180_v18 }
  0x1c   : > { %545 = vmatprep.mubr.msk.f32.mxu1 %vm201_vm0, %v188_v19 }
  0x1e   : > { %534 = vmatmul.mubr.msk.f32.gmra.mrb[6].mxu0 %vm201_vm0, %v181_v20 }
  0x1f   : > { %546 = vmatmul.mubr.msk.f32.gmra.mrb[6].mxu1 %vm201_vm0, %v189_v21 }
  0xe5   : > { %v526_v23 = vpop.f32.mrb[0].mxu0 }
  0xe6   : > { %v538_v24 = vpop.f32.mrb[0].mxu1  ;;  %v322_v25 = vadd.f32 %v526_v23, %v477_v22  ;;  %v316_v27 = vpop.f32.mrb[1].mxu0 }
  0xe7   : > { %v362_v26 = vadd.f32 %v538_v24, %v477_v22  ;;  %v356_v28 = vpop.f32.mrb[1].mxu1  ;;  %v317_v29 = vadd.f32 %v477_v22, %v316_v27 }
  0xe8   : > { %v357_v30 = vadd.f32 %v477_v22, %v356_v28  ;;  %397 = vst.msk [vmem:[%s666_s4 + $0x8] sm:$0xff] %vm395_vm1, %v322_v25 }
  0xe9   : > { %405 = vst.msk [vmem:[%s666_s4 + $0x48] sm:$0xff] %vm395_vm1, %v362_v26  ;;  %396 = vst.msk [vmem:[%s666_s4] sm:$0xff] %vm395_vm1, %v317_v29  ;;  %v529_v31 = vpop.f32.mrb[2].mxu0 }
  0xea   : > { %404 = vst.msk [vmem:[%s666_s4 + $0x40] sm:$0xff] %vm395_vm1, %v357_v30  ;;  %v541_v32 = vpop.f32.mrb[2].mxu1  ;;  %v332_v33 = vadd.f32 %v529_v31, %v477_v22  ;;  %v326_v35 = vpop.f32.mrb[3].mxu0 }
  0xeb   : > { %v372_v34 = vadd.f32 %v541_v32, %v477_v22  ;;  %v366_v36 = vpop.f32.mrb[3].mxu1  ;;  %v327_v37 = vadd.f32 %v477_v22, %v326_v35 }
  0xec   : > { %v367_v38 = vadd.f32 %v477_v22, %v366_v36  ;;  %399 = vst.msk [vmem:[%s666_s4 + $0x18] sm:$0xff] %vm395_vm1, %v332_v33 }
  0xed   : > { %407 = vst.msk [vmem:[%s666_s4 + $0x58] sm:$0xff] %vm395_vm1, %v372_v34  ;;  %398 = vst.msk [vmem:[%s666_s4 + $0x10] sm:$0xff] %vm395_vm1, %v327_v37  ;;  %v532_v39 = vpop.f32.mrb[4].mxu0 }
  0xee   : > { %406 = vst.msk [vmem:[%s666_s4 + $0x50] sm:$0xff] %vm395_vm1, %v367_v38  ;;  %v544_v40 = vpop.f32.mrb[4].mxu1  ;;  %v342_v41 = vadd.f32 %v532_v39, %v477_v22  ;;  %v336_v43 = vpop.f32.mrb[5].mxu0 }
  0xef   : > { %v382_v42 = vadd.f32 %v544_v40, %v477_v22  ;;  %v376_v44 = vpop.f32.mrb[5].mxu1  ;;  %v337_v45 = vadd.f32 %v477_v22, %v336_v43 }
  0xf0   : > { %v377_v46 = vadd.f32 %v477_v22, %v376_v44  ;;  %401 = vst.msk [vmem:[%s666_s4 + $0x28] sm:$0xff] %vm395_vm1, %v342_v41 }
  0xf1   : > { %409 = vst.msk [vmem:[%s666_s4 + $0x68] sm:$0xff] %vm395_vm1, %v382_v42  ;;  %400 = vst.msk [vmem:[%s666_s4 + $0x20] sm:$0xff] %vm395_vm1, %v337_v45  ;;  %v535_v47 = vpop.f32.mrb[6].mxu0 }
  0xf2   : > { %408 = vst.msk [vmem:[%s666_s4 + $0x60] sm:$0xff] %vm395_vm1, %v377_v46  ;;  %v547_v48 = vpop.f32.mrb[6].mxu1  ;;  %v352_v49 = vadd.f32 %v535_v47, %v477_v22  ;;  %v346_v51 = vpop.f32.mrb[7].mxu0 }
  0xf3   : > { %v392_v50 = vadd.f32 %v547_v48, %v477_v22  ;;  %v386_v52 = vpop.f32.mrb[7].mxu1  ;;  %v347_v53 = vadd.f32 %v477_v22, %v346_v51 }
  0xf4   : > { %v387_v54 = vadd.f32 %v477_v22, %v386_v52  ;;  %403 = vst.msk [vmem:[%s666_s4 + $0x38] sm:$0xff] %vm395_vm1, %v352_v49 }
  0xf5   : > { %411 = vst.msk [vmem:[%s666_s4 + $0x78] sm:$0xff] %vm395_vm1, %v392_v50  ;;  %402 = vst.msk [vmem:[%s666_s4 + $0x30] sm:$0xff] %vm395_vm1, %v347_v53 }
  0xf6   : > { %410 = vst.msk [vmem:[%s666_s4 + $0x70] sm:$0xff] %vm395_vm1, %v387_v54 }
  0xf7 PF: > { %s13_s12 = sadd.s32 1, %s574_s12  }
  0xf8   : > { %p10_p4 = scmp.ge.s32.totalorder %s13_s12, 4  }
  0xfa   :  { %12 = sbr.rel (!%p10_p4) target bundleno = 1 (0x1), region = 62 }

</bundles_post_ra>
